<compile_context>
chip_gen: v7x
topology: tpu7x:2x2x1
jax: 0.10.0
libtpu: 0.0.40
codegen_flags: <defaults>
</compile_context>

<pallas_src>
import functools

import jax
import jax.numpy as jnp
from jax.experimental import pallas as pl
from jax.experimental.pallas import tpu as pltpu


def _cdist_kernel(xr_ref, xc_ref, sqr_ref, sqc_ref, dist_ref, *, precision):
    """One (row-tile, col-tile) block of dist(x, x).

    xr_ref  : (TM, D)   row tile of x
    xc_ref  : (TN, D)   column tile of x
    sqr_ref : (TM, 1)   precomputed ||x_i||^2 for this row tile
    sqc_ref : (1, TN)   precomputed ||x_j||^2 for this column tile
    dist_ref: (TM, TN)  output tile of the distance matrix
    """
    # Gram term on the MXU: NT contraction on row-major tiles, f32 accumulator.
    gram = jax.lax.dot_general(
        xr_ref[...], xc_ref[...],
        dimension_numbers=(((1,), (1,)), ((), ())),
        preferred_element_type=jnp.float32,
        precision=precision,
    )                                                       # (TM, TN) f32

    d2 = sqr_ref[...] + sqc_ref[...] - 2.0 * gram           # (TM, TN), VPU

    tm, tn = d2.shape
    rows = pl.program_id(0) * tm + jax.lax.broadcasted_iota(jnp.int32, (tm, tn), 0)
    cols = pl.program_id(1) * tn + jax.lax.broadcasted_iota(jnp.int32, (tm, tn), 1)
    # Self-distance is exactly 0; also clamp tiny negatives from cancellation.
    d2 = jnp.where(rows == cols, 0.0, jnp.maximum(d2, 0.0))

    dist_ref[...] = jnp.sqrt(d2).astype(dist_ref.dtype)


def _default_tile(n, candidates):
    for t in candidates:
        if n % t == 0:
            return t
    return n


def pairwise_distance_layer(x, *, tile_m=None, tile_n=None):
    """x: (N, D) -> (N, D + N) == cat([x, cdist(x, x)], axis=1)."""
    n, d = x.shape

    if tile_m is None:
        tile_m = _default_tile(n, (256, 128, 64, 32, 16, 8))
    if tile_n is None:
        tile_n = _default_tile(n, (512, 256, 128))

    assert n % tile_m == 0 and (tile_m % 8 == 0 or tile_m == n), tile_m
    assert n % tile_n == 0 and (tile_n % 128 == 0 or tile_n == n), tile_n

    # Squared row norms: computed once (f32), fed lane/sublane-oriented so the
    # kernel does no cross-lane reductions or transposes.
    xf = x.astype(jnp.float32)
    sq = jnp.sum(xf * xf, axis=1)
    sq_col = sq.reshape(n, 1)
    sq_row = sq.reshape(1, n)

    # f32 inputs: accurate multi-pass MXU matmul (matches torch.cdist numerics);
    # bf16/low-precision inputs stay on the fast native MXU path.
    precision = (jax.lax.Precision.HIGHEST
                 if x.dtype == jnp.dtype(jnp.float32) else jax.lax.Precision.DEFAULT)
    kernel = functools.partial(_cdist_kernel, precision=precision)

    itemsize = x.dtype.itemsize
    grid = (n // tile_m, n // tile_n)

    dist = pl.pallas_call(
        kernel,
        out_shape=jax.ShapeDtypeStruct((n, n), x.dtype),
        grid_spec=pltpu.PrefetchScalarGridSpec(
            num_scalar_prefetch=0,
            grid=grid,
            in_specs=[
                pl.BlockSpec((tile_m, d), lambda i, j: (i, 0)),   # row tile of x
                pl.BlockSpec((tile_n, d), lambda i, j: (j, 0)),   # col tile of x
                pl.BlockSpec((tile_m, 1), lambda i, j: (i, 0)),   # ||x_i||^2
                pl.BlockSpec((1, tile_n), lambda i, j: (0, j)),   # ||x_j||^2
            ],
            out_specs=pl.BlockSpec((tile_m, tile_n), lambda i, j: (i, j)),
        ),
        compiler_params=pltpu.CompilerParams(
            dimension_semantics=("parallel", "parallel"),
        ),
        cost_estimate=pl.CostEstimate(
            flops=2 * n * n * d,
            transcendentals=n * n,                        # one sqrt per entry
            bytes_accessed=(2 * n * d + n * n) * itemsize + 2 * n * 4,
        ),
    )(x, x, sq_col, sq_row)

    # Passthrough copy + concat is plain memcpy: do it outside the kernel so the
    # kernel output stays lane-dense.
    return jnp.concatenate([x, dist], axis=1)


if __name__ == "__main__":
    def _reference(x):
        diff = x[:, None, :] - x[None, :, :]
        dist = jnp.sqrt(jnp.sum(diff * diff, axis=-1))
        return jnp.concatenate([x, dist], axis=1)

    # Case 1: small shape matching the module's 2-D input (N=8 points, D=32).
    x1 = jax.random.normal(jax.random.PRNGKey(0), (8, 32), dtype=jnp.float32)
    out1 = jax.block_until_ready(pairwise_distance_layer(x1))
    assert out1.shape == (8, 32 + 8)
    assert jnp.allclose(out1, _reference(x1), atol=1e-3, rtol=1e-3)

    # Case 2: exercise the tiled 2-D grid ((2, 2) steps, megacore-shardable).
    x2 = jax.random.normal(jax.random.PRNGKey(0), (256, 32), dtype=jnp.float32)
    out2 = jax.block_until_ready(
        pairwise_distance_layer(x2, tile_m=128, tile_n=128))
    assert out2.shape == (256, 32 + 256)
    assert jnp.allclose(out2, _reference(x2), atol=1e-3, rtol=1e-3)

    print("KERNEL_OK")
</pallas_src>

<mosaic_0001>
module attributes {stable_mosaic.version = 11 : i64} {
  func.func @_cdist_kernel(%arg0: i32, %arg1: i32, %arg2: memref<8x32xf32, #tpu.memory_space<vmem>>, %arg3: memref<8x32xf32, #tpu.memory_space<vmem>>, %arg4: memref<8x1xf32, #tpu.memory_space<vmem>>, %arg5: memref<1x8xf32, #tpu.memory_space<vmem>>, %arg6: memref<8x8xf32, #tpu.memory_space<vmem>>) attributes {dimension_semantics = [#tpu.dimension_semantics<parallel>, #tpu.dimension_semantics<parallel>], iteration_bounds = array<i64: 1, 1>, scalar_prefetch = 0 : i64, scratch_operands = 0 : i64, tpu.core_type = #tpu.core_type<tc>, window_params = [{transform_indices = @transform_0, window_bounds = array<i64: 8, 32>}, {transform_indices = @transform_1, window_bounds = array<i64: 8, 32>}, {transform_indices = @transform_2, window_bounds = array<i64: 8, 1>}, {transform_indices = @transform_3, window_bounds = array<i64: 1, 8>}, {transform_indices = @transform_4, window_bounds = array<i64: 8, 8>}]} {
    %c0 = arith.constant 0 : index
    %c0_0 = arith.constant 0 : index
    %0 = vector.load %arg2[%c0, %c0_0] : memref<8x32xf32, #tpu.memory_space<vmem>>, vector<8x32xf32>
    %c0_1 = arith.constant 0 : index
    %c0_2 = arith.constant 0 : index
    %1 = vector.load %arg3[%c0_1, %c0_2] : memref<8x32xf32, #tpu.memory_space<vmem>>, vector<8x32xf32>
    %cst = arith.constant dense<0.000000e+00> : vector<8x8xf32>
    %2 = tpu.matmul %0, %1, %cst {dimension_numbers = #tpu.dot_dimension_numbers<[1], [1], [0], [0], [0, 0, 1, 0], [], []>, precision = #tpu.contract_precision<fp32>} : vector<8x32xf32>, vector<8x32xf32>, vector<8x8xf32> -> vector<8x8xf32>
    %c0_3 = arith.constant 0 : index
    %c0_4 = arith.constant 0 : index
    %3 = vector.load %arg4[%c0_3, %c0_4] : memref<8x1xf32, #tpu.memory_space<vmem>>, vector<8x1xf32>
    %c0_5 = arith.constant 0 : index
    %c0_6 = arith.constant 0 : index
    %4 = vector.load %arg5[%c0_5, %c0_6] : memref<1x8xf32, #tpu.memory_space<vmem>>, vector<1x8xf32>
    %5 = vector.broadcast %3 : vector<8x1xf32> to vector<8x8xf32>
    %6 = vector.broadcast %4 : vector<1x8xf32> to vector<8x8xf32>
    %7 = arith.addf %5, %6 : vector<8x8xf32>
    %cst_7 = arith.constant 2.000000e+00 : f32
    %8 = vector.broadcast %cst_7 : f32 to vector<8x8xf32>
    %9 = arith.mulf %8, %2 : vector<8x8xf32>
    %10 = arith.subf %7, %9 : vector<8x8xf32>
    %c8_i32 = arith.constant 8 : i32
    %11 = arith.muli %arg0, %c8_i32 : i32
    %12 = tpu.iota {dimensions = array<i32: 0>} : vector<8x8xi32>
    %13 = vector.broadcast %11 : i32 to vector<8x8xi32>
    %14 = arith.addi %13, %12 : vector<8x8xi32>
    %c8_i32_8 = arith.constant 8 : i32
    %15 = arith.muli %arg1, %c8_i32_8 : i32
    %16 = tpu.iota {dimensions = array<i32: 1>} : vector<8x8xi32>
    %17 = vector.broadcast %15 : i32 to vector<8x8xi32>
    %18 = arith.addi %17, %16 : vector<8x8xi32>
    %19 = arith.cmpi eq, %14, %18 : vector<8x8xi32>
    %cst_9 = arith.constant 0.000000e+00 : f32
    %20 = vector.broadcast %cst_9 : f32 to vector<8x8xf32>
    %21 = arith.maximumf %10, %20 : vector<8x8xf32>
    %cst_10 = arith.constant 0.000000e+00 : f32
    %22 = vector.broadcast %cst_10 : f32 to vector<8x8xf32>
    %23 = arith.select %19, %22, %21 : vector<8x8xi1>, vector<8x8xf32>
    %24 = math.sqrt %23 : vector<8x8xf32>
    %c0_11 = arith.constant 0 : index
    %c0_12 = arith.constant 0 : index
    %25 = vector.load %arg6[%c0_11, %c0_12] : memref<8x8xf32, #tpu.memory_space<vmem>>, vector<8x8xf32>
    tpu.vector_store %arg6[%c0_11, %c0_12], %24 {strides = array<i32>} : memref<8x8xf32, #tpu.memory_space<vmem>>, vector<8x8xf32>,
    return
  }
  func.func @transform_0(%arg0: i32, %arg1: i32) -> (i32, i32) {
    %c0_i32 = arith.constant 0 : i32
    %c0_i32_0 = arith.constant 0 : i32
    return %arg0, %c0_i32 : i32, i32
  }
  func.func @transform_1(%arg0: i32, %arg1: i32) -> (i32, i32) {
    %c0_i32 = arith.constant 0 : i32
    %c0_i32_0 = arith.constant 0 : i32
    return %arg1, %c0_i32 : i32, i32
  }
  func.func @transform_2(%arg0: i32, %arg1: i32) -> (i32, i32) {
    %c0_i32 = arith.constant 0 : i32
    %c0_i32_0 = arith.constant 0 : i32
    return %arg0, %c0_i32 : i32, i32
  }
  func.func @transform_3(%arg0: i32, %arg1: i32) -> (i32, i32) {
    %c0_i32 = arith.constant 0 : i32
    %c0_i32_0 = arith.constant 0 : i32
    return %c0_i32, %arg1 : i32, i32
  }
  func.func @transform_4(%arg0: i32, %arg1: i32) -> (i32, i32) {
    %c0_i32 = arith.constant 0 : i32
    return %arg0, %arg1 : i32, i32
  }
}

</mosaic_0001>

<bundles_post_ra>
// kernel: tpu_custom_call.1
= control target key start
LH: loop header
LB: loop body
LE: loop exit
PB: predicated region body
PF: predicated region fallthrough
CT: control target
= control target key end

     0   :  { %9 = vsyncpa [#allocation3], 0  ;;  %s715_s0 = inlined_call_operand.vmem [shape: f32[8,32], index: 0, kind: input, shape index: {}]   ;;  %s716_s1 = inlined_call_operand.hbm [shape: f32[8,32], index: 1, kind: input, shape index: {}]   ;;  %s717_s2 = inlined_call_operand.vmem [shape: f32[8,1], index: 2, kind: input, shape index: {}]   ;;  %s718_s3 = inlined_call_operand.vmem [shape: f32[1,8], index: 3, kind: input, shape index: {}]   ;;  %s719_s4 = inlined_call_operand.hbm [shape: f32[8,8], index: 4, kind: output, shape index: {}]  }
   0x1   :  { %10 = vsyncpa [#allocation4], 0  ;;  %s646_s15 = smov [#allocation2]   ;;  %s598_s19 = scalar_lea.hbm %s716_s1, 128 }
   0x2   :  { %s19_s16 = sshll.u32 %s646_s15, 4  ;;  %p599_p0 = scmp.ne.s32.totalorder %s716_s1, %s598_s19  ;;  %s20_s16 = int_to_ptr.vmem [resolvable:$true] %s19_s16 }
   0x3   :  { %p602_p1 = scmp.lt.u32.totalorder %s598_s19, %s716_s1 }
   0x5   :  { %p604_p2 = pnand %p602_p1, %p599_p0 }
   0x7   :  { %607 = shalt.err (!%p604_p2)
}
   0x8   :  { %s608_s24 = scalar_lea.vmem %s20_s16, 128  ;;  %p613_p4 = scmp.lt.s32.totalorder %s20_s16, %s20_s16 }
   0x9   :  { %p609_p3 = scmp.ne.s32.totalorder %s20_s16, %s608_s24  ;;  %p614_p5 = scmp.lt.s32.totalorder %s608_s24, %s608_s24 }
   0xb   :  { %p615_p6 = por %p614_p5, %p613_p4 }
   0xd   :  { %p616_p7 = pnand %p615_p6, %p609_p3 }
   0xf   :  { %619 = shalt.err (!%p616_p7)
}
  0x10   :  { %22 = dma.hbm_to_vmem [thread:$0]  %s716_s1, 128, %s20_s16, [#allocation3]  }
  0x11   :  { %642 = dma.done.wait [#allocation3], 128  }
  0x12   :  { %643 = vsyncadd [#allocation3], 4294967168  ;;  %v647_v0 = vmov 0.0   ;;  %vm648_vm0 = vmmov 0   ;;  %v649_v1 = vmov 0   ;;  %vm32_vm1 = vcmask 261120  }
  0x13   :  { %566 = vmatprep.subr.mxu0 %v647_v0  ;;  %551 = vmatprep.subr.mxu1 %v647_v0  ;;  %v31_v2 = vld [vmem:[#allocation2] sm:$0xff]  ;;  %v502_v20 = vlaneseq  ;;  %s650_s30 = smov [#allocation5]   ;;  %vm521_vm4 = vcmask 64512  }
  0x14   :  { %568 = vmatprep.mubr.msk.f32.mxu0 %vm648_vm0, %v647_v0  ;;  %553 = vmatprep.mubr.msk.f32.mxu1 %vm648_vm0, %v647_v0  ;;  %v30_v3 = vld [vmem:[%s715_s0] sm:$0xff]  ;;  %v37_v5 = vsel %vm32_vm1, %v31_v2, 0  ;;  %s529_s5 = sshll.u32 %s650_s30, 4  ;;  %s530_s5 = int_to_ptr.vmem [resolvable:$true] %s529_s5 }
  0x15   :  { %595 = vset.pattern.permute.xlu0 %v649_v1  ;;  %v485_v4 = vld [vmem:[%s717_s2] sm:$0xff]  ;;  %v34_v6 = vsel %vm32_vm1, %v30_v3, 0  ;;  %v40_v7 = vand.u32 4294901760, %v37_v5  ;;  %v503_v26 = vshrl.u32 %v502_v20, 7  ;;  %v508_v27 = vand.u32 127, %v502_v20  ;;  %p625_p9 = scmp.lt.s32.totalorder %s530_s5, %s530_s5 }
  0x16   :  { %489 = vperm.xlu0 %595, %v485_v4   ;;  %v105_v8 = vand.u32 4294901760, %v34_v6  ;;  %v538_v19 = vld [vmem:[%s718_s3] ss:$0 sm:$0xff]  ;;  %s620_s3 = scalar_lea.vmem %s530_s5, 128 }
  0x17   :  { %v117_v9 = vsub.f32 %v37_v5, %v40_v7  ;;  %567 = vmatpush3.xpose.msra.mxu0 %v40_v7  ;;  %552 = vmatpush3.xpose.msra.mxu1 %v40_v7  ;;  %vm511_vm2 = vcmp.eq.s32.totalorder %v503_v26, %v508_v27  ;;  %p621_p8 = scmp.ne.s32.totalorder %s530_s5, %s620_s3  ;;  %p626_p10 = scmp.lt.s32.totalorder %s620_s3, %s620_s3 }
  0x18   :  { %v106_v10 = vsub.f32 %v34_v6, %v105_v8  ;;  %556 = vmatprep.subr.mxu1 %v647_v0  ;;  %571 = vmatprep.subr.mxu0 %v647_v0 }
  0x19   :  { %v118_v12 = vand.u32 4294901760, %v117_v9  ;;  %p627_p11 = por %p626_p10, %p625_p9 }
  0x1a   :  { %v107_v11 = vand.u32 4294901760, %v106_v10 }
  0x1b   :  { %v119_v14 = vsub.f32 %v117_v9, %v118_v12  ;;  %p628_p12 = pnand %p627_p11, %p621_p8 }
  0x1c   :  { %569 = vmatmul.mubr.f32.vlgmr.msra.gmra.mrb[0].mxu0 %v107_v11  ;;  %v108_v13 = vsub.f32 %v106_v10, %v107_v11 }
  0x1d   :  { %572 = vmatpush3.xpose.msra.mxu0 %v118_v12  ;;  %573 = vmatprep.mubr.msk.f32.mxu0 %vm648_vm0, %v647_v0  ;;  %v120_v16 = vand.u32 4294901760, %v119_v14 }
  0x1e   :  { %v109_v15 = vand.u32 4294901760, %v108_v13  ;;  %576 = vmatprep.subr.mxu0 %v647_v0 }
  0x20   :  { %554 = vmatmul.mubr.f32.vlgmr.msra.gmra.mrb[0].mxu1 %v109_v15 }
  0x21   :  { %557 = vmatpush3.xpose.msra.mxu1 %v120_v16  ;;  %558 = vmatprep.mubr.msk.f32.mxu1 %vm648_vm0, %v647_v0 }
  0x22   :  { %561 = vmatprep.subr.mxu1 %v647_v0 }
  0x24   :  { %574 = vmatmul.mubr.f32.vlgmr.msra.gmra.mrb[0].mxu0 %v105_v8 }
  0x25   :  { %577 = vmatpush3.xpose.msra.mxu0 %v40_v7  ;;  %578 = vmatprep.mubr.msk.f32.mxu0 %vm648_vm0, %v647_v0 }
  0x28   :  { %559 = vmatmul.mubr.f32.vlgmr.msra.gmra.mrb[0].mxu1 %v105_v8 }
  0x29   :  { %562 = vmatpush3.xpose.msra.mxu1 %v117_v9  ;;  %563 = vmatprep.mubr.msk.f32.mxu1 %vm648_vm0, %v647_v0 }
  0x2c   :  { %579 = vmatmul.mubr.f32.vlgmr.msra.gmra.mrb[0].mxu0 %v105_v8 }
  0x30   :  { %564 = vmatmul.mubr.f32.vlgmr.msra.gmra.mrb[0].mxu1 %v106_v10 }
  0x95   :  { %v490_v21 = vpop.permute.xlu0 %489 }
  0x96   :  { %v498_v25 = vadd.f32 %v538_v19, %v490_v21 }
  0xff   :  { %v481_v17 = vpop.f32.mrb[0].mxu0 }
 0x100   :  { %v580_v18 = vpop.f32.mrb[1].mxu0 }
 0x103   :  { %v261_v22 = vpop.f32.mrb[0].mxu1 }
 0x104   :  { %v581_v23 = vadd.f32 %v481_v17, %v261_v22  ;;  %v565_v24 = vpop.f32.mrb[1].mxu1 }
 0x106   :  { %v499_v28 = vmul.f32 2.0, %v581_v23 }
 0x108   :  { %v500_v29 = vsub.f32 %v498_v25, %v499_v28 }
 0x10a   :  { %v512_v30 = vmax.f32 %v500_v29, 0.0 }
 0x10c   :  { %v513_v31 = vsel %vm511_vm2, 0.0, %v512_v30 }
 0x10d   :  { %596 = vrsqrt.f32 %v513_v31  ;;  %vm516_vm3 = vcmp.eq.f32.partialorder %v513_v31, inf  ;;  %v519_v34 = vand.u32 2147483648, %v513_v31  ;;  %vm518_vm5 = vcmp.eq.f32.partialorder %v513_v31, 0.0 }
 0x117   :  { %v597_v32 = vpop.eup %596 }
 0x118   :  { %v515_v33 = vmul.f32 %v597_v32, %v513_v31 }
 0x11a   :  { %v517_v35 = vsel %vm516_vm3, %v513_v31, %v515_v33 }
 0x11b   :  { %v520_v36 = vsel %vm518_vm5, %v519_v34, %v517_v35 }
 0x11c   :  { %522 = vst.msk [vmem:[#allocation5] sm:$0xff] %vm521_vm4, %v520_v36 }
 0x11d   :  { %631 = shalt.err (!%p628_p12)
}
 0x11e   :  { %s632_s8 = scalar_lea.hbm %s719_s4, 128 }
 0x11f   :  { %p633_p13 = scmp.ne.s32.totalorder %s719_s4, %s632_s8  ;;  %p636_p0 = scmp.lt.u32.totalorder %s632_s8, %s719_s4 }
 0x121   :  { %p638_p1 = pnand %p636_p0, %p633_p13 }
 0x123   :  { %641 = shalt.err (!%p638_p1)
}
 0x124   :  { %532 = dma.vmem_to_hbm [thread:$0]  %s530_s5, 128, %s719_s4, [#allocation4]  }
 0x125   :  { %644 = dma.done.wait [#allocation4], 128  }
 0x126   :  { %645 = vsyncadd [#allocation4], 4294967168 }
 0x127   :  { %536 = vsyncpa [#allocation3], 1 }
 0x128   :  { %537 = vsyncpa [#allocation4], 1 }

</bundles_post_ra>
